<compile_context>
chip_gen: v7x
topology: tpu7x:2x2x1
jax: 0.10.0
libtpu: 0.0.40
codegen_flags: <defaults>
</compile_context>

<pallas_src>
import functools
import math

import jax
import jax.numpy as jnp
from jax.experimental import pallas as pl
from jax.experimental.pallas import tpu as pltpu

_MASK_VALUE = -1e30  # finite "minus infinity" (matches finfo.min semantics w/ softmax)


# ----------------------------- tiling helpers ------------------------------

def _round_up(x, m):
    return ((x + m - 1) // m) * m


def _choose_tile(dim, candidates, align):
    """Pick the biggest candidate that divides `dim`; otherwise a padded tile."""
    for t in candidates:
        if dim % t == 0:
            return t
    return min(candidates[0], _round_up(dim, align))


def _pick_seq_tile(S, candidates=(256, 128)):
    for t in candidates:
        if S % t == 0:
            return t
    return S


def _pad2d(a, rows, cols):
    pr, pc = rows - a.shape[0], cols - a.shape[1]
    if pr or pc:
        a = jnp.pad(a, ((0, pr), (0, pc)))
    return a


# ----------------------------- Pallas kernels ------------------------------

def _linear_kernel(x_ref, w_ref, b_ref, o_ref, *, activation):
    # bf16 x bf16 -> f32 accumulation on the MXU.
    y = jnp.dot(x_ref[...], w_ref[...], preferred_element_type=jnp.float32)
    y = y + b_ref[...].astype(jnp.float32)
    if activation == "gelu":
        # DistilBERT uses the exact (erf-based) GELU.
        y = jax.nn.gelu(y, approximate=False)
    o_ref[...] = y.astype(o_ref.dtype)


def linear(x, w, b, activation=None):
    """y = x @ w + b (optionally GELU). x:(M,K) bf16, w:(K,N) bf16, b:(N,)."""
    M, K = x.shape
    N = w.shape[1]
    tm = _choose_tile(M, (512, 256, 128), 8)
    tn = _choose_tile(N, (512, 384, 256, 128), 128)
    Mp = _round_up(M, tm)
    Np = _round_up(N, tn)

    xp = _pad2d(x, Mp, K)
    wp = _pad2d(w, K, Np)
    bp = jnp.pad(b, (0, Np - N)).reshape(1, Np)

    out = pl.pallas_call(
        functools.partial(_linear_kernel, activation=activation),
        out_shape=jax.ShapeDtypeStruct((Mp, Np), x.dtype),
        grid=(Mp // tm, Np // tn),
        in_specs=[
            pl.BlockSpec((tm, K), lambda i, j: (i, 0)),
            pl.BlockSpec((K, tn), lambda i, j: (0, j)),
            pl.BlockSpec((1, tn), lambda i, j: (0, j)),
        ],
        out_specs=pl.BlockSpec((tm, tn), lambda i, j: (i, j)),
        compiler_params=pltpu.CompilerParams(
            dimension_semantics=("parallel", "parallel")),
    )(xp, wp, bp)
    if Mp != M or Np != N:
        out = out[:M, :N]
    return out


def _add_ln_kernel(x_ref, r_ref, g_ref, b_ref, o_ref, *, eps):
    h = x_ref[...].astype(jnp.float32) + r_ref[...].astype(jnp.float32)
    mu = jnp.mean(h, axis=-1, keepdims=True)
    var = jnp.mean(jnp.square(h - mu), axis=-1, keepdims=True)
    y = (h - mu) * jax.lax.rsqrt(var + eps)
    o_ref[...] = (y * g_ref[...].astype(jnp.float32)
                  + b_ref[...].astype(jnp.float32)).astype(o_ref.dtype)


def add_layernorm(x, residual, gamma, beta, eps=1e-12, out_dtype=None):
    """LayerNorm(x + residual) over the last dim. x,residual:(M,H)."""
    M, H = x.shape
    out_dtype = out_dtype or x.dtype
    tm = _choose_tile(M, (512, 256, 128), 8)
    Mp = _round_up(M, tm)
    xp = _pad2d(x, Mp, H)
    rp = _pad2d(residual, Mp, H)
    out = pl.pallas_call(
        functools.partial(_add_ln_kernel, eps=eps),
        out_shape=jax.ShapeDtypeStruct((Mp, H), out_dtype),
        grid=(Mp // tm,),
        in_specs=[
            pl.BlockSpec((tm, H), lambda i: (i, 0)),
            pl.BlockSpec((tm, H), lambda i: (i, 0)),
            pl.BlockSpec((1, H), lambda i: (0, 0)),
            pl.BlockSpec((1, H), lambda i: (0, 0)),
        ],
        out_specs=pl.BlockSpec((tm, H), lambda i: (i, 0)),
        compiler_params=pltpu.CompilerParams(dimension_semantics=("parallel",)),
    )(xp, rp, gamma.reshape(1, H), beta.reshape(1, H))
    return out[:M] if Mp != M else out


def _flash_attn_kernel(mask_ref, q_ref, k_ref, v_ref, o_ref,
                       m_sc, l_sc, acc_sc, *, scale):
    kv = pl.program_id(2)

    @pl.when(kv == 0)
    def _():
        m_sc[...] = jnp.full(m_sc.shape, -jnp.inf, jnp.float32)
        l_sc[...] = jnp.zeros(l_sc.shape, jnp.float32)
        acc_sc[...] = jnp.zeros(acc_sc.shape, jnp.float32)

    # scores for this (q-tile, kv-tile): bf16 x bf16 -> f32 on the MXU
    s = jax.lax.dot_general(q_ref[...], k_ref[...],
                            (((1,), (1,)), ((), ())),
                            preferred_element_type=jnp.float32) * scale  # (tq, tk)
    # in-kernel mask from the (1, tk) keep vector (1 = attend, 0 = masked)
    s = jnp.where(mask_ref[...] > 0, s, _MASK_VALUE)

    m_prev = m_sc[...]                                           # (tq, 1)
    m_new = jnp.maximum(m_prev, jnp.max(s, axis=-1, keepdims=True))
    alpha = jnp.exp(m_prev - m_new)
    p = jnp.exp(s - m_new)                                       # (tq, tk)
    l_sc[...] = alpha * l_sc[...] + jnp.sum(p, axis=-1, keepdims=True)
    acc_sc[...] = alpha * acc_sc[...] + jnp.dot(
        p.astype(v_ref.dtype), v_ref[...], preferred_element_type=jnp.float32)
    m_sc[...] = m_new

    @pl.when(kv == pl.num_programs(2) - 1)
    def _():
        o_ref[...] = (acc_sc[...] *
                      pl.reciprocal(l_sc[...], approx=True)).astype(o_ref.dtype)


def flash_attention(q, k, v, keep_mask, nh, scale):
    """q,k,v:(B*nh, S, Dh) bf16; keep_mask:(B, 1, S) f32 (1 = attend)."""
    BH, S, Dh = q.shape
    tq = _pick_seq_tile(S)
    tk = _pick_seq_tile(S)
    return pl.pallas_call(
        functools.partial(_flash_attn_kernel, scale=scale),
        out_shape=jax.ShapeDtypeStruct((BH, S, Dh), q.dtype),
        grid=(BH, S // tq, S // tk),
        in_specs=[
            pl.BlockSpec((None, 1, tk), lambda bh, qi, ki: (bh // nh, 0, ki)),
            pl.BlockSpec((None, tq, Dh), lambda bh, qi, ki: (bh, qi, 0)),
            pl.BlockSpec((None, tk, Dh), lambda bh, qi, ki: (bh, ki, 0)),
            pl.BlockSpec((None, tk, Dh), lambda bh, qi, ki: (bh, ki, 0)),
        ],
        out_specs=pl.BlockSpec((None, tq, Dh), lambda bh, qi, ki: (bh, qi, 0)),
        scratch_shapes=[
            pltpu.VMEM((tq, 1), jnp.float32),     # running max
            pltpu.VMEM((tq, 1), jnp.float32),     # running denom
            pltpu.VMEM((tq, Dh), jnp.float32),    # output accumulator
        ],
        compiler_params=pltpu.CompilerParams(
            dimension_semantics=("parallel", "parallel", "arbitrary")),
    )(keep_mask, q, k, v)


# ------------------------------ JAX glue ------------------------------------

def _split_heads(x2d, B, S, nh, dh):
    return x2d.reshape(B, S, nh, dh).transpose(0, 2, 1, 3).reshape(B * nh, S, dh)


def _merge_heads(x3d, B, S, nh, dh):
    return x3d.reshape(B, nh, S, dh).transpose(0, 2, 1, 3).reshape(B * S, nh * dh)


def transformer_layer(x2d, keep_mask, lp, B, S, nh, dh):
    H = nh * dh
    # --- fused QKV projection (one matmul against (H, 3H)) ---
    qkv = linear(x2d, lp["qkv_w"], lp["qkv_b"])
    q, k, v = qkv[:, :H], qkv[:, H:2 * H], qkv[:, 2 * H:]
    ctx = flash_attention(_split_heads(q, B, S, nh, dh),
                          _split_heads(k, B, S, nh, dh),
                          _split_heads(v, B, S, nh, dh),
                          keep_mask, nh, 1.0 / math.sqrt(dh))
    sa_out = linear(_merge_heads(ctx, B, S, nh, dh), lp["o_w"], lp["o_b"])
    sa_out = add_layernorm(sa_out, x2d, lp["sa_ln_g"], lp["sa_ln_b"])
    # --- feed-forward ---
    h = linear(sa_out, lp["ff1_w"], lp["ff1_b"], activation="gelu")
    h = linear(h, lp["ff2_w"], lp["ff2_b"])
    return add_layernorm(h, sa_out, lp["out_ln_g"], lp["out_ln_b"])


def custom_model_forward(params, inputs, is_ids, attention_mask):
    """Mirrors CustomModel.forward: returns (cls_embedding, logits)."""
    cfg = params["cfg"]
    H, nh = cfg["hidden"], cfg["heads"]
    dh = H // nh
    if is_ids:
        B, S = inputs.shape
        word = jnp.take(params["word_emb"], inputs, axis=0)      # (B,S,H) f32
    else:
        B, S, _ = inputs.shape
        word = inputs.astype(jnp.float32)
    pos = jnp.broadcast_to(params["pos_emb"][:S][None, :, :], (B, S, H))
    # Embedding LayerNorm(word + pos) — fused add+LN kernel, cast to bf16 activations.
    x = add_layernorm(word.reshape(B * S, H), pos.reshape(B * S, H),
                      params["emb_ln_g"], params["emb_ln_b"],
                      out_dtype=jnp.bfloat16)

    # (B,1,S) keep mask (1 = attend, 0 = masked); broadcast happens inside the kernel.
    keep = attention_mask.astype(jnp.float32).reshape(B, 1, S)

    for lp in params["layers"]:
        x = transformer_layer(x, keep, lp, B, S, nh, dh)

    last_hidden = x.reshape(B, S, H)
    cls_embedding = last_hidden[:, 0, :].astype(jnp.float32)      # (B, H)
    # Tiny classifier head (N = num_labels < 128): leave to XLA.
    logits = jnp.dot(cls_embedding, params["cls_w"]) + params["cls_b"]
    return cls_embedding, logits


# --------------------------- parameter init --------------------------------

def init_params(key, *, vocab, max_pos, hidden, heads, ffn, n_layers, num_labels):
    wdt = jnp.bfloat16  # MXU-native weight dtype

    def nrm(k, shape, scale=0.02, dtype=wdt):
        return (scale * jax.random.normal(k, shape, dtype=jnp.float32)).astype(dtype)

    keys = iter(jax.random.split(key, 8 + 8 * n_layers))
    params = {
        "cfg": {"hidden": hidden, "heads": heads},
        "word_emb": nrm(next(keys), (vocab, hidden), dtype=jnp.float32),
        "pos_emb": nrm(next(keys), (max_pos, hidden), dtype=jnp.float32),
        "emb_ln_g": jnp.ones((hidden,), jnp.float32),
        "emb_ln_b": jnp.zeros((hidden,), jnp.float32),
        "cls_w": nrm(next(keys), (hidden, num_labels), dtype=jnp.float32),
        "cls_b": jnp.zeros((num_labels,), jnp.float32),
        "layers": [],
    }
    for _ in range(n_layers):
        lp = {
            "qkv_w": nrm(next(keys), (hidden, 3 * hidden)),
            "qkv_b": jnp.zeros((3 * hidden,), wdt),
            "o_w": nrm(next(keys), (hidden, hidden)),
            "o_b": jnp.zeros((hidden,), wdt),
            "sa_ln_g": jnp.ones((hidden,), jnp.float32),
            "sa_ln_b": jnp.zeros((hidden,), jnp.float32),
            "ff1_w": nrm(next(keys), (hidden, ffn)),
            "ff1_b": jnp.zeros((ffn,), wdt),
            "ff2_w": nrm(next(keys), (ffn, hidden)),
            "ff2_b": jnp.zeros((hidden,), wdt),
            "out_ln_g": jnp.ones((hidden,), jnp.float32),
            "out_ln_b": jnp.zeros((hidden,), jnp.float32),
        }
        params["layers"].append(lp)
    return params


# --------------------------------- main -------------------------------------

if __name__ == "__main__":
    # Small DistilBERT-like config (synthetic weights; bert.* "frozen" params only
    # affect gradients, not the forward pass).
    B, S = 2, 8
    HIDDEN, HEADS, FFN, LAYERS = 64, 2, 128, 2
    VOCAB, MAX_POS, NUM_LABELS = 100, 32, 3

    root = jax.random.PRNGKey(0)
    k_params, k_ids, k_emb = jax.random.split(root, 3)
    params = init_params(k_params, vocab=VOCAB, max_pos=MAX_POS, hidden=HIDDEN,
                         heads=HEADS, ffn=FFN, n_layers=LAYERS,
                         num_labels=NUM_LABELS)

    input_ids = jax.random.randint(k_ids, (B, S), 0, VOCAB, dtype=jnp.int32)
    attention_mask = jnp.ones((B, S), jnp.float32).at[1, 6:].set(0.0)  # pad tail of seq 1

    # is_ids=True path (input_ids)
    cls_emb, logits = custom_model_forward(params, input_ids, True, attention_mask)
    jax.block_until_ready((cls_emb, logits))
    assert cls_emb.shape == (B, HIDDEN) and logits.shape == (B, NUM_LABELS)
    assert bool(jnp.all(jnp.isfinite(logits)))

    # is_ids=False path (inputs_embeds)
    inputs_embeds = 0.02 * jax.random.normal(k_emb, (B, S, HIDDEN), dtype=jnp.float32)
    cls_emb2, logits2 = custom_model_forward(params, inputs_embeds, False, attention_mask)
    jax.block_until_ready((cls_emb2, logits2))
    assert cls_emb2.shape == (B, HIDDEN) and logits2.shape == (B, NUM_LABELS)
    assert bool(jnp.all(jnp.isfinite(logits2)))

    print("KERNEL_OK")
</pallas_src>

<mosaic_0001>
module attributes {stable_mosaic.version = 11 : i64} {
  func.func @_add_ln_kernel(%arg0: i32, %arg1: memref<16x64xf32, #tpu.memory_space<vmem>>, %arg2: memref<16x64xf32, #tpu.memory_space<vmem>>, %arg3: memref<1x64xf32, #tpu.memory_space<vmem>>, %arg4: memref<1x64xf32, #tpu.memory_space<vmem>>, %arg5: memref<16x64xbf16, #tpu.memory_space<vmem>>) attributes {dimension_semantics = [#tpu.dimension_semantics<parallel>], iteration_bounds = array<i64: 1>, scalar_prefetch = 0 : i64, scratch_operands = 0 : i64, tpu.core_type = #tpu.core_type<tc>, window_params = [{transform_indices = @transform_0, window_bounds = array<i64: 16, 64>}, {transform_indices = @transform_1, window_bounds = array<i64: 16, 64>}, {pipeline_mode = #tpu.pipeline_mode<synchronous>, transform_indices = @transform_2, window_bounds = array<i64: 1, 64>}, {pipeline_mode = #tpu.pipeline_mode<synchronous>, transform_indices = @transform_3, window_bounds = array<i64: 1, 64>}, {transform_indices = @transform_4, window_bounds = array<i64: 16, 64>}]} {
    %c0 = arith.constant 0 : index
    %c0_0 = arith.constant 0 : index
    %0 = vector.load %arg1[%c0, %c0_0] : memref<16x64xf32, #tpu.memory_space<vmem>>, vector<16x64xf32>
    %c0_1 = arith.constant 0 : index
    %c0_2 = arith.constant 0 : index
    %1 = vector.load %arg2[%c0_1, %c0_2] : memref<16x64xf32, #tpu.memory_space<vmem>>, vector<16x64xf32>
    %2 = arith.addf %0, %1 : vector<16x64xf32>
    %cst = arith.constant dense<0.000000e+00> : vector<16xf32>
    %3 = vector.multi_reduction <add>, %2, %cst [1] : vector<16x64xf32> to vector<16xf32>
    %4 = vector.shape_cast %3 : vector<16xf32> to vector<16x1xf32>
    %cst_3 = arith.constant 6.400000e+01 : f32
    %5 = vector.broadcast %cst_3 : f32 to vector<16x1xf32>
    %6 = arith.divf %4, %5 : vector<16x1xf32>
    %7 = vector.broadcast %6 : vector<16x1xf32> to vector<16x64xf32>
    %8 = arith.subf %2, %7 : vector<16x64xf32>
    %9 = arith.mulf %8, %8 : vector<16x64xf32>
    %cst_4 = arith.constant dense<0.000000e+00> : vector<16xf32>
    %10 = vector.multi_reduction <add>, %9, %cst_4 [1] : vector<16x64xf32> to vector<16xf32>
    %11 = vector.shape_cast %10 : vector<16xf32> to vector<16x1xf32>
    %cst_5 = arith.constant 6.400000e+01 : f32
    %12 = vector.broadcast %cst_5 : f32 to vector<16x1xf32>
    %13 = arith.divf %11, %12 : vector<16x1xf32>
    %14 = vector.broadcast %6 : vector<16x1xf32> to vector<16x64xf32>
    %15 = arith.subf %2, %14 : vector<16x64xf32>
    %cst_6 = arith.constant 9.99999996E-13 : f32
    %16 = vector.broadcast %cst_6 : f32 to vector<16x1xf32>
    %17 = arith.addf %13, %16 : vector<16x1xf32>
    %18 = math.rsqrt %17 : vector<16x1xf32>
    %19 = vector.broadcast %18 : vector<16x1xf32> to vector<16x64xf32>
    %20 = arith.mulf %15, %19 : vector<16x64xf32>
    %c0_7 = arith.constant 0 : index
    %c0_8 = arith.constant 0 : index
    %21 = vector.load %arg3[%c0_7, %c0_8] : memref<1x64xf32, #tpu.memory_space<vmem>>, vector<1x64xf32>
    %22 = vector.broadcast %21 : vector<1x64xf32> to vector<16x64xf32>
    %23 = arith.mulf %20, %22 : vector<16x64xf32>
    %c0_9 = arith.constant 0 : index
    %c0_10 = arith.constant 0 : index
    %24 = vector.load %arg4[%c0_9, %c0_10] : memref<1x64xf32, #tpu.memory_space<vmem>>, vector<1x64xf32>
    %25 = vector.broadcast %24 : vector<1x64xf32> to vector<16x64xf32>
    %26 = arith.addf %23, %25 : vector<16x64xf32>
    %27 = arith.truncf %26 : vector<16x64xf32> to vector<16x64xbf16>
    %c0_11 = arith.constant 0 : index
    %c0_12 = arith.constant 0 : index
    %28 = vector.load %arg5[%c0_11, %c0_12] : memref<16x64xbf16, #tpu.memory_space<vmem>>, vector<16x64xbf16>
    tpu.vector_store %arg5[%c0_11, %c0_12], %27 {strides = array<i32>} : memref<16x64xbf16, #tpu.memory_space<vmem>>, vector<16x64xbf16>,
    return
  }
  func.func @transform_0(%arg0: i32) -> (i32, i32) {
    %c0_i32 = arith.constant 0 : i32
    %c0_i32_0 = arith.constant 0 : i32
    return %arg0, %c0_i32 : i32, i32
  }
  func.func @transform_1(%arg0: i32) -> (i32, i32) {
    %c0_i32 = arith.constant 0 : i32
    %c0_i32_0 = arith.constant 0 : i32
    return %arg0, %c0_i32 : i32, i32
  }
  func.func @transform_2(%arg0: i32) -> (i32, i32) {
    %c0_i32 = arith.constant 0 : i32
    %c0_i32_0 = arith.constant 0 : i32
    %c0_i32_1 = arith.constant 0 : i32
    return %c0_i32, %c0_i32_0 : i32, i32
  }
  func.func @transform_3(%arg0: i32) -> (i32, i32) {
    %c0_i32 = arith.constant 0 : i32
    %c0_i32_0 = arith.constant 0 : i32
    %c0_i32_1 = arith.constant 0 : i32
    return %c0_i32, %c0_i32_0 : i32, i32
  }
  func.func @transform_4(%arg0: i32) -> (i32, i32) {
    %c0_i32 = arith.constant 0 : i32
    %c0_i32_0 = arith.constant 0 : i32
    return %arg0, %c0_i32 : i32, i32
  }
}

</mosaic_0001>

<bundles_post_ra>
// kernel: tpu_custom_call.1
= control target key start
LH: loop header
LB: loop body
LE: loop exit
PB: predicated region body
PF: predicated region fallthrough
CT: control target
= control target key end

     0   :  { %9 = vsyncpa [#allocation3], 0  ;;  %s294_s0 = inlined_call_operand.hbm [shape: f32[16,64], index: 0, kind: input, shape index: {}]   ;;  %s295_s1 = inlined_call_operand.hbm [shape: f32[16,64], index: 1, kind: input, shape index: {}]   ;;  %s296_s2 = inlined_call_operand.vmem [shape: f32[1,64], index: 2, kind: input, shape index: {}]   ;;  %s297_s3 = inlined_call_operand.vmem [shape: f32[1,64], index: 3, kind: input, shape index: {}]   ;;  %s298_s4 = inlined_call_operand.hbm [shape: bf16[16,64], index: 4, kind: output, shape index: {}]  }
   0x1   :  { %10 = vsyncpa [#allocation6], 0 }
   0x2   :  { %11 = vsyncpa [#allocation4], 0  ;;  %s216_s15 = smov [#allocation2]   ;;  %s144_s19 = scalar_lea.hbm %s294_s0, 256 }
   0x3   :  { %s17_s16 = sshll.u32 %s216_s15, 4  ;;  %p145_p0 = scmp.ne.s32.totalorder %s294_s0, %s144_s19  ;;  %s18_s16 = int_to_ptr.vmem [resolvable:$true] %s17_s16 }
   0x4   :  { %p148_p1 = scmp.lt.u32.totalorder %s144_s19, %s294_s0 }
   0x6   :  { %p150_p2 = pnand %p148_p1, %p145_p0 }
   0x8   :  { %153 = shalt.err (!%p150_p2)
}
   0x9   :  { %s154_s24 = scalar_lea.vmem %s18_s16, 256  ;;  %p159_p4 = scmp.lt.s32.totalorder %s18_s16, %s18_s16 }
   0xa   :  { %p155_p3 = scmp.ne.s32.totalorder %s18_s16, %s154_s24  ;;  %p160_p5 = scmp.lt.s32.totalorder %s154_s24, %s154_s24 }
   0xc   :  { %p161_p6 = por %p160_p5, %p159_p4 }
   0xe   :  { %p162_p7 = pnand %p161_p6, %p155_p3 }
  0x10   :  { %165 = shalt.err (!%p162_p7)
}
  0x11   :  { %s217_s25 = smov 128   ;;  %s218_s26 = smov 8  }
  0x12   :  { %23 = dma.hbm_to_vmem [thread:$0]  %s294_s0, 256, %s18_s16, [#allocation3], %s217_s25, %s217_s25, %s218_s26  }
  0x13   :  { %s219_s29 = smov [#allocation5]   ;;  %s166_s7 = scalar_lea.hbm %s295_s1, 256 }
  0x14   :  { %s29_s30 = sshll.u32 %s219_s29, 4  ;;  %p167_p8 = scmp.ne.s32.totalorder %s295_s1, %s166_s7  ;;  %s30_s30 = int_to_ptr.vmem [resolvable:$true] %s29_s30 }
  0x15   :  { %p170_p9 = scmp.lt.u32.totalorder %s166_s7, %s295_s1 }
  0x17   :  { %p172_p10 = pnand %p170_p9, %p167_p8 }
  0x19   :  { %175 = shalt.err (!%p172_p10)
}
  0x1a   :  { %s176_s12 = scalar_lea.vmem %s30_s30, 256  ;;  %p181_p12 = scmp.lt.s32.totalorder %s30_s30, %s30_s30 }
  0x1b   :  { %p177_p11 = scmp.ne.s32.totalorder %s30_s30, %s176_s12  ;;  %p182_p13 = scmp.lt.s32.totalorder %s176_s12, %s176_s12 }
  0x1d   :  { %p183_p0 = por %p182_p13, %p181_p12 }
  0x1f   :  { %p184_p1 = pnand %p183_p0, %p177_p11 }
  0x21   :  { %187 = shalt.err (!%p184_p1)
}
  0x22   :  { %35 = dma.hbm_to_vmem [thread:$0]  %s295_s1, 256, %s30_s30, [#allocation6], %s217_s25, %s217_s25, %s218_s26  }
  0x23   :  { %210 = dma.done.wait [#allocation3], 256  }
  0x24   :  { %211 = vsyncadd [#allocation3], 4294967040 }
  0x25   :  { %212 = dma.done.wait [#allocation6], 256  }
  0x26   :  { %213 = vsyncadd [#allocation6], 4294967040  ;;  %v46_v0 = vld [vmem:[#allocation2] sm:$0xff]  ;;  %v48_v1 = vld [vmem:[#allocation5] sm:$0xff]  ;;  %vm52_vm0 = vcmask 523264   ;;  %vm106_vm1 = vcmask 519168  }
  0x27   :  { %v47_v2 = vld [vmem:[#allocation2 + $0x8] sm:$0xff]  ;;  %v50_v3 = vadd.f32 %v48_v1, %v46_v0  ;;  %v49_v4 = vld [vmem:[#allocation5 + $0x8] sm:$0xff]  ;;  %v127_v25 = vld [vmem:[%s296_s2] ss:$0 sm:$0xff]  ;;  %s220_s17 = smov [#allocation7]  }
  0x28   :  { %v51_v5 = vadd.f32 %v49_v4, %v47_v2  ;;  %v128_v27 = vld [vmem:[%s297_s3] ss:$0 sm:$0xff]  ;;  %s114_s18 = sshll.u32 %s220_s17, 4  ;;  %s115_s18 = int_to_ptr.vmem [resolvable:$true] %s114_s18 }
  0x29   :  { %v53_v6 = vsel %vm52_vm0, %v50_v3, 0.0  ;;  %s188_s2 = scalar_lea.vmem %s115_s18, 128  ;;  %p193_p3 = scmp.lt.s32.totalorder %s115_s18, %s115_s18 }
  0x2a   :  { %54 = vadd.xlane.f32.xlu0 %v53_v6  ;;  %v56_v7 = vsel %vm52_vm0, %v51_v5, 0.0  ;;  %p189_p2 = scmp.ne.s32.totalorder %s115_s18, %s188_s2  ;;  %p194_p4 = scmp.lt.s32.totalorder %s188_s2, %s188_s2 }
  0x2c   :  { %p195_p5 = por %p194_p4, %p193_p3 }
  0x2e   :  { %57 = vadd.xlane.f32.xlu0 %v56_v7  ;;  %p196_p6 = pnand %p195_p5, %p189_p2 }
  0xb7   :  { %v55_v8 = vpop.xlane.xlu0 %54 }
  0xb8   :  { %v60_v9 = vmul.f32 0.015625, %v55_v8 }
  0xba   :  { %v62_v10 = vsub.f32 %v50_v3, %v60_v9 }
  0xbb   :  { %v58_v11 = vpop.xlane.xlu0 %57 }
  0xbc   :  { %v61_v12 = vmul.f32 0.015625, %v58_v11  ;;  %v64_v13 = vmul.f32 %v62_v10, %v62_v10 }
  0xbe   :  { %v63_v14 = vsub.f32 %v51_v5, %v61_v12  ;;  %v66_v15 = vsel %vm52_vm0, %v64_v13, 0.0 }
  0xbf   :  { %67 = vadd.xlane.f32.xlu1 %v66_v15 }
  0xc0   :  { %v65_v16 = vmul.f32 %v63_v14, %v63_v14 }
  0xc2   :  { %v69_v17 = vsel %vm52_vm0, %v65_v16, 0.0 }
  0xc3   :  { %70 = vadd.xlane.f32.xlu1 %v69_v17 }
 0x14c   :  { %v68_v18 = vpop.xlane.xlu1 %67 }
 0x14d   :  { %v72_v19 = vmul.f32 0.015625, %v68_v18 }
 0x14f   :  { %v74_v20 = vadd.f32 1e-12, %v72_v19 }
 0x150   :  { %v71_v21 = vpop.xlane.xlu1 %70 }
 0x151   :  { %140 = vrsqrt.f32 %v74_v20  ;;  %v73_v22 = vmul.f32 0.015625, %v71_v21 }
 0x153   :  { %v75_v23 = vadd.f32 1e-12, %v73_v22 }
 0x155   :  { %142 = vrsqrt.f32 %v75_v23 }
 0x15b   :  { %v141_v24 = vpop.eup %140 }
 0x15c   :  { %v78_v26 = vmul.f32 %v141_v24, %v62_v10 }
 0x15e   :  { %v87_v28 = vmul.f32 %v127_v25, %v78_v26 }
 0x15f   :  { %v143_v29 = vpop.eup %142 }
 0x160   :  { %v79_v30 = vmul.f32 %v143_v29, %v63_v14  ;;  %v96_v31 = vadd.f32 %v128_v27, %v87_v28 }
 0x162   :  { %v88_v32 = vmul.f32 %v127_v25, %v79_v30  ;;  %v131_v33 = vpack.c.bf16 %v96_v31, %v96_v31 }
 0x164   :  { %v97_v34 = vadd.f32 %v128_v27, %v88_v32  ;;  %107 = vst.msk [vmem:[#allocation7] sm:$0xf] %vm106_vm1, %v131_v33 }
 0x166   :  { %v132_v35 = vpack.c.bf16 %v97_v34, %v97_v34 }
 0x168   :  { %108 = vst.msk [vmem:[#allocation7 + $0x4] sm:$0xf] %vm106_vm1, %v132_v35 }
 0x169   :  { %199 = shalt.err (!%p196_p6)
}
 0x16a   :  { %s200_s20 = scalar_lea.hbm %s298_s4, 128 }
 0x16b   :  { %p201_p7 = scmp.ne.s32.totalorder %s298_s4, %s200_s20  ;;  %p204_p8 = scmp.lt.u32.totalorder %s200_s20, %s298_s4 }
 0x16d   :  { %p206_p9 = pnand %p204_p8, %p201_p7 }
 0x16f   :  { %209 = shalt.err (!%p206_p9)
}
 0x170   :  { %s221_s25 = smov 64   ;;  %s222_s26 = smov 4  }
 0x171   :  { %120 = dma.vmem_to_hbm [thread:$0]  %s115_s18, 128, %s298_s4, [#allocation4], %s221_s25, %s221_s25, %s222_s26  }
 0x172   :  { %214 = dma.done.wait [#allocation4], 128  }
 0x173   :  { %215 = vsyncadd [#allocation4], 4294967168 }
 0x174   :  { %124 = vsyncpa [#allocation3], 1 }
 0x175   :  { %125 = vsyncpa [#allocation6], 1 }
 0x176   :  { %126 = vsyncpa [#allocation4], 1 }

</bundles_post_ra>
